<compile_context>
chip_gen: v7x
topology: tpu7x:2x2x1
jax: 0.10.0
libtpu: 0.0.40
codegen_flags: <defaults>
</compile_context>

<pallas_src>
import functools

import numpy as np
import jax
import jax.numpy as jnp
from jax.experimental import pallas as pl
from jax.experimental.pallas import tpu as pltpu

EPS = 1e-5


def _round_up(x, m):
    return ((x + m - 1) // m) * m


def _pool_double_conv_kernel(xp_ref, mask_ref, w1_ref, g1_ref, be1_ref,
                             w2_ref, g2_ref, be2_ref, o_ref, *, wp, n_valid):
    """Fused [3x3 'same' conv + training-mode BatchNorm + ReLU] x 2.

    xp_ref   : [C_pad, P]  zero-padded pooled input, flat padded spatial on lanes
    mask_ref : [1, P]      1.0 at valid interior positions, 0.0 at halo / lane padding
    w*_ref   : [O_pad, 9*C_pad]  weight with K ordered (tap-major, channel-minor)
    g*/be*   : [O_pad, 1]  BN gamma / beta
    o_ref    : [O_pad, P]  lane-dense output in the same padded flat layout
    """
    P = xp_ref.shape[1]
    mask = mask_ref[...]                                   # [1, P]
    inv_n = 1.0 / float(n_valid)

    def conv_bn_relu(act, w_ref, g_ref, be_ref):
        # act: [C, P] f32, zero outside each image's valid interior.
        taps = []
        for t in range(9):
            dh, dw = t // 3 - 1, t % 3 - 1
            d = dh * wp + dw                               # flat lane offset of this tap
            # rolled[p] = act[p + d]  (valid for interior p; halo lanes are masked later)
            taps.append(act if d == 0 else pltpu.roll(act, shift=(-d) % P, axis=1))
        stacked = jnp.concatenate(taps, axis=0)            # [9*C, P] (aligned 8-row pieces)
        acc = jnp.dot(w_ref[...], stacked,
                      preferred_element_type=jnp.float32)  # [O, P] f32 (single MXU matmul)

        # Training-mode BatchNorm over the valid positions only (one-pass stats, all f32).
        am = acc * mask
        mean = jnp.sum(am, axis=1, keepdims=True) * inv_n                         # [O, 1]
        var = jnp.maximum(jnp.sum(am * am, axis=1, keepdims=True) * inv_n
                          - mean * mean, 0.0)                                      # [O, 1]
        scale = g_ref[...] * jax.lax.rsqrt(var + EPS)
        shift = be_ref[...] - mean * scale
        return jnp.maximum(acc * scale + shift, 0.0)       # ReLU; halo lanes still garbage

    # Stage 1; re-zero the halo so h1 (same padded flat layout) is directly the stage-2 input.
    h1 = conv_bn_relu(xp_ref[...], w1_ref, g1_ref, be1_ref) * mask
    # Stage 2; halo garbage in h2 is discarded by the glue slice, so no final mask needed.
    h2 = conv_bn_relu(h1, w2_ref, g2_ref, be2_ref)
    o_ref[...] = h2                                        # unmasked lane-dense store


def _conv_weight_mat(w, c_pad, o_pad):
    """PyTorch [O, I, 3, 3] -> [o_pad, 9*c_pad] f32 with K index = (kh*3 + kw)*c_pad + c."""
    O, I = w.shape[0], w.shape[1]
    wz = jnp.pad(w, ((0, o_pad - O), (0, c_pad - I), (0, 0), (0, 0)))
    return jnp.transpose(wz, (0, 2, 3, 1)).reshape(o_pad, 9 * c_pad).astype(jnp.float32)


def _pad_vec(v, o_pad):
    return jnp.pad(v, (0, o_pad - v.shape[0])).reshape(o_pad, 1).astype(jnp.float32)


@jax.jit
def pool_double_conv(x, params):
    """x: [N, C_in, H, W] float32 (NCHW).  Returns [N, C_out, H//2, W//2] (NCHW)."""
    w1, b1, g1, be1, w2, b2, g2, be2 = params
    # Conv bias is exactly cancelled by training-mode BatchNorm (batch statistics).  If this
    # module were run in eval mode (running stats), the bias must be kept.
    del b1, b2
    N, C_in, H, W = x.shape
    C_out = w1.shape[0]
    H2, W2 = H // 2, W // 2
    Hp, Wp = H2 + 2, W2 + 2

    C_pad = _round_up(C_in, 8)      # sublane-aligned channel rows (keeps the K-stacking aligned)
    O_pad = _round_up(C_out, 8)
    valid = N * Hp * Wp
    P = _round_up(valid, 128)       # lane-dense padded flat spatial length

    # Glue: MaxPool2d(2) (block-reshape max), channels-to-sublanes transpose, zero 'same'
    # padding ring, flatten + lane padding.  All tiny elementwise/layout work on the raw input.
    # TODO(synk): fuse the 4-phase pool max and the NCHW->[C,P] relayout into the kernel in the
    # grid-tiled version to halve input-side HBM traffic.
    x_c = jnp.transpose(x, (1, 0, 2, 3))                               # [C_in, N, H, W]
    pooled = x_c.reshape(C_in, N, H2, 2, W2, 2).max(axis=(3, 5))       # [C_in, N, H2, W2]
    xp = jnp.pad(pooled, ((0, C_pad - C_in), (0, 0), (1, 1), (1, 1)))  # +channel rows, +pad ring
    xp = jnp.pad(xp.reshape(C_pad, valid), ((0, 0), (0, P - valid)))   # [C_pad, P]

    mask_np = np.zeros((N, Hp, Wp), np.float32)
    mask_np[:, 1:1 + H2, 1:1 + W2] = 1.0
    mask = jnp.asarray(np.pad(mask_np.reshape(1, valid), ((0, 0), (0, P - valid))))

    kernel = functools.partial(_pool_double_conv_kernel, wp=Wp, n_valid=N * H2 * W2)
    out = pl.pallas_call(
        kernel,
        out_shape=jax.ShapeDtypeStruct((O_pad, P), jnp.float32),
        in_specs=[pl.BlockSpec(memory_space=pltpu.MemorySpace.VMEM)] * 8,
        out_specs=pl.BlockSpec(memory_space=pltpu.MemorySpace.VMEM),
    )(xp, mask,
      _conv_weight_mat(w1, C_pad, O_pad), _pad_vec(g1, O_pad), _pad_vec(be1, O_pad),
      _conv_weight_mat(w2, O_pad, O_pad), _pad_vec(g2, O_pad), _pad_vec(be2, O_pad))

    # [O_pad, P] padded flat layout -> NCHW interior.
    out = out[:C_out, :valid].reshape(C_out, N, Hp, Wp)[:, :, 1:1 + H2, 1:1 + W2]
    return jnp.transpose(out, (1, 0, 2, 3))


def _reference(x, params):
    # Pure-JAX reference of the PyTorch forward (fresh module, training-mode BatchNorm),
    # kept at HIGHEST precision as the f32 ground truth.
    w1, b1, g1, be1, w2, b2, g2, be2 = params
    xp = jax.lax.reduce_window(x, -jnp.inf, jax.lax.max,
                               (1, 1, 2, 2), (1, 1, 2, 2), 'VALID')

    def block(h, w, b, g, be):
        y = jax.lax.conv_general_dilated(h, w, (1, 1), ((1, 1), (1, 1)),
                                         dimension_numbers=('NCHW', 'OIHW', 'NCHW'),
                                         precision=jax.lax.Precision.HIGHEST)
        y = y + b[None, :, None, None]
        m = jnp.mean(y, axis=(0, 2, 3), keepdims=True)
        v = jnp.mean((y - m) ** 2, axis=(0, 2, 3), keepdims=True)
        yn = (y - m) * jax.lax.rsqrt(v + EPS)
        return jnp.maximum(yn * g[None, :, None, None] + be[None, :, None, None], 0.0)

    return block(block(xp, w1, b1, g1, be1), w2, b2, g2, be2)


if __name__ == "__main__":
    in_c, out_c = 4, 8
    N, H, W = 2, 16, 16

    key = jax.random.PRNGKey(0)
    ks = jax.random.split(key, 9)
    x = jax.random.normal(ks[0], (N, in_c, H, W), jnp.float32)

    # Deterministic synthetic parameters (shapes follow nn.Conv2d / nn.BatchNorm2d in __init__).
    w1 = 0.1 * jax.random.normal(ks[1], (out_c, in_c, 3, 3), jnp.float32)
    b1 = 0.1 * jax.random.normal(ks[2], (out_c,), jnp.float32)
    g1 = 1.0 + 0.1 * jax.random.normal(ks[3], (out_c,), jnp.float32)
    be1 = 0.1 * jax.random.normal(ks[4], (out_c,), jnp.float32)
    w2 = 0.1 * jax.random.normal(ks[5], (out_c, out_c, 3, 3), jnp.float32)
    b2 = 0.1 * jax.random.normal(ks[6], (out_c,), jnp.float32)
    g2 = 1.0 + 0.1 * jax.random.normal(ks[7], (out_c,), jnp.float32)
    be2 = 0.1 * jax.random.normal(ks[8], (out_c,), jnp.float32)
    params = (w1, b1, g1, be1, w2, b2, g2, be2)

    out = jax.block_until_ready(pool_double_conv(x, params))
    ref = jax.block_until_ready(_reference(x, params))

    assert out.shape == (N, out_c, H // 2, W // 2), out.shape
    # Tolerance accounts for default (bf16-operand, f32-accumulate) MXU precision in the kernel
    # vs. the HIGHEST-precision f32 reference, amplified slightly by the two BatchNorm stages.
    np.testing.assert_allclose(np.asarray(out), np.asarray(ref), rtol=1e-2, atol=3e-2)
    print("KERNEL_OK")
</pallas_src>

<mosaic_0001>
module attributes {stable_mosaic.version = 11 : i64} {
  func.func @_pool_double_conv_kernel(%arg0: memref<8x256xf32, #tpu.memory_space<vmem>>, %arg1: memref<1x256xf32, #tpu.memory_space<vmem>>, %arg2: memref<8x72xf32, #tpu.memory_space<vmem>>, %arg3: memref<8x1xf32, #tpu.memory_space<vmem>>, %arg4: memref<8x1xf32, #tpu.memory_space<vmem>>, %arg5: memref<8x72xf32, #tpu.memory_space<vmem>>, %arg6: memref<8x1xf32, #tpu.memory_space<vmem>>, %arg7: memref<8x1xf32, #tpu.memory_space<vmem>>, %arg8: memref<8x256xf32, #tpu.memory_space<vmem>>) attributes {dimension_semantics = [], scalar_prefetch = 0 : i64, scratch_operands = 0 : i64, tpu.core_type = #tpu.core_type<tc>} {
    %c0 = arith.constant 0 : index
    %c0_0 = arith.constant 0 : index
    %0 = vector.load %arg1[%c0, %c0_0] : memref<1x256xf32, #tpu.memory_space<vmem>>, vector<1x256xf32>
    %c0_1 = arith.constant 0 : index
    %c0_2 = arith.constant 0 : index
    %1 = vector.load %arg0[%c0_1, %c0_2] : memref<8x256xf32, #tpu.memory_space<vmem>>, vector<8x256xf32>
    %c11_i32 = arith.constant 11 : i32
    %2 = tpu.dynamic_rotate %1 by %c11_i32 dim 1 : vector<8x256xf32>, i32 -> vector<8x256xf32>
    %c10_i32 = arith.constant 10 : i32
    %3 = tpu.dynamic_rotate %1 by %c10_i32 dim 1 : vector<8x256xf32>, i32 -> vector<8x256xf32>
    %c9_i32 = arith.constant 9 : i32
    %4 = tpu.dynamic_rotate %1 by %c9_i32 dim 1 : vector<8x256xf32>, i32 -> vector<8x256xf32>
    %c1_i32 = arith.constant 1 : i32
    %5 = tpu.dynamic_rotate %1 by %c1_i32 dim 1 : vector<8x256xf32>, i32 -> vector<8x256xf32>
    %c255_i32 = arith.constant 255 : i32
    %6 = tpu.dynamic_rotate %1 by %c255_i32 dim 1 : vector<8x256xf32>, i32 -> vector<8x256xf32>
    %c247_i32 = arith.constant 247 : i32
    %7 = tpu.dynamic_rotate %1 by %c247_i32 dim 1 : vector<8x256xf32>, i32 -> vector<8x256xf32>
    %c246_i32 = arith.constant 246 : i32
    %8 = tpu.dynamic_rotate %1 by %c246_i32 dim 1 : vector<8x256xf32>, i32 -> vector<8x256xf32>
    %c245_i32 = arith.constant 245 : i32
    %9 = tpu.dynamic_rotate %1 by %c245_i32 dim 1 : vector<8x256xf32>, i32 -> vector<8x256xf32>
    %10 = tpu.concatenate %2, %3, %4, %5, %1, %6, %7, %8, %9 in 0 : vector<8x256xf32>, vector<8x256xf32>, vector<8x256xf32>, vector<8x256xf32>, vector<8x256xf32>, vector<8x256xf32>, vector<8x256xf32>, vector<8x256xf32>, vector<8x256xf32> -> vector<72x256xf32>
    %c0_3 = arith.constant 0 : index
    %c0_4 = arith.constant 0 : index
    %11 = vector.load %arg2[%c0_3, %c0_4] : memref<8x72xf32, #tpu.memory_space<vmem>>, vector<8x72xf32>
    %cst = arith.constant dense<0.000000e+00> : vector<8x256xf32>
    %12 = tpu.matmul %11, %10, %cst {dimension_numbers = #tpu.dot_dimension_numbers<[1], [0], [0], [1], [0, 0, 1, 1], [], []>} : vector<8x72xf32>, vector<72x256xf32>, vector<8x256xf32> -> vector<8x256xf32>
    %13 = vector.broadcast %0 : vector<1x256xf32> to vector<8x256xf32>
    %14 = arith.mulf %12, %13 : vector<8x256xf32>
    %cst_5 = arith.constant dense<0.000000e+00> : vector<8xf32>
    %15 = vector.multi_reduction <add>, %14, %cst_5 [1] : vector<8x256xf32> to vector<8xf32>
    %16 = vector.shape_cast %15 : vector<8xf32> to vector<8x1xf32>
    %cst_6 = arith.constant 7.812500e-03 : f32
    %17 = vector.broadcast %cst_6 : f32 to vector<8x1xf32>
    %18 = arith.mulf %16, %17 : vector<8x1xf32>
    %19 = arith.mulf %14, %14 : vector<8x256xf32>
    %cst_7 = arith.constant dense<0.000000e+00> : vector<8xf32>
    %20 = vector.multi_reduction <add>, %19, %cst_7 [1] : vector<8x256xf32> to vector<8xf32>
    %21 = vector.shape_cast %20 : vector<8xf32> to vector<8x1xf32>
    %cst_8 = arith.constant 7.812500e-03 : f32
    %22 = vector.broadcast %cst_8 : f32 to vector<8x1xf32>
    %23 = arith.mulf %21, %22 : vector<8x1xf32>
    %24 = arith.mulf %18, %18 : vector<8x1xf32>
    %25 = arith.subf %23, %24 : vector<8x1xf32>
    %cst_9 = arith.constant 0.000000e+00 : f32
    %26 = vector.broadcast %cst_9 : f32 to vector<8x1xf32>
    %27 = arith.maximumf %25, %26 : vector<8x1xf32>
    %c0_10 = arith.constant 0 : index
    %c0_11 = arith.constant 0 : index
    %28 = vector.load %arg3[%c0_10, %c0_11] : memref<8x1xf32, #tpu.memory_space<vmem>>, vector<8x1xf32>
    %cst_12 = arith.constant 9.99999974E-6 : f32
    %29 = vector.broadcast %cst_12 : f32 to vector<8x1xf32>
    %30 = arith.addf %27, %29 : vector<8x1xf32>
    %31 = math.rsqrt %30 : vector<8x1xf32>
    %32 = arith.mulf %28, %31 : vector<8x1xf32>
    %c0_13 = arith.constant 0 : index
    %c0_14 = arith.constant 0 : index
    %33 = vector.load %arg4[%c0_13, %c0_14] : memref<8x1xf32, #tpu.memory_space<vmem>>, vector<8x1xf32>
    %34 = arith.mulf %18, %32 : vector<8x1xf32>
    %35 = arith.subf %33, %34 : vector<8x1xf32>
    %36 = vector.broadcast %32 : vector<8x1xf32> to vector<8x256xf32>
    %37 = arith.mulf %12, %36 : vector<8x256xf32>
    %38 = vector.broadcast %35 : vector<8x1xf32> to vector<8x256xf32>
    %39 = arith.addf %37, %38 : vector<8x256xf32>
    %cst_15 = arith.constant 0.000000e+00 : f32
    %40 = vector.broadcast %cst_15 : f32 to vector<8x256xf32>
    %41 = arith.maximumf %39, %40 : vector<8x256xf32>
    %42 = vector.broadcast %0 : vector<1x256xf32> to vector<8x256xf32>
    %43 = arith.mulf %41, %42 : vector<8x256xf32>
    %c11_i32_16 = arith.constant 11 : i32
    %44 = tpu.dynamic_rotate %43 by %c11_i32_16 dim 1 : vector<8x256xf32>, i32 -> vector<8x256xf32>
    %c10_i32_17 = arith.constant 10 : i32
    %45 = tpu.dynamic_rotate %43 by %c10_i32_17 dim 1 : vector<8x256xf32>, i32 -> vector<8x256xf32>
    %c9_i32_18 = arith.constant 9 : i32
    %46 = tpu.dynamic_rotate %43 by %c9_i32_18 dim 1 : vector<8x256xf32>, i32 -> vector<8x256xf32>
    %c1_i32_19 = arith.constant 1 : i32
    %47 = tpu.dynamic_rotate %43 by %c1_i32_19 dim 1 : vector<8x256xf32>, i32 -> vector<8x256xf32>
    %c255_i32_20 = arith.constant 255 : i32
    %48 = tpu.dynamic_rotate %43 by %c255_i32_20 dim 1 : vector<8x256xf32>, i32 -> vector<8x256xf32>
    %c247_i32_21 = arith.constant 247 : i32
    %49 = tpu.dynamic_rotate %43 by %c247_i32_21 dim 1 : vector<8x256xf32>, i32 -> vector<8x256xf32>
    %c246_i32_22 = arith.constant 246 : i32
    %50 = tpu.dynamic_rotate %43 by %c246_i32_22 dim 1 : vector<8x256xf32>, i32 -> vector<8x256xf32>
    %c245_i32_23 = arith.constant 245 : i32
    %51 = tpu.dynamic_rotate %43 by %c245_i32_23 dim 1 : vector<8x256xf32>, i32 -> vector<8x256xf32>
    %52 = tpu.concatenate %44, %45, %46, %47, %43, %48, %49, %50, %51 in 0 : vector<8x256xf32>, vector<8x256xf32>, vector<8x256xf32>, vector<8x256xf32>, vector<8x256xf32>, vector<8x256xf32>, vector<8x256xf32>, vector<8x256xf32>, vector<8x256xf32> -> vector<72x256xf32>
    %c0_24 = arith.constant 0 : index
    %c0_25 = arith.constant 0 : index
    %53 = vector.load %arg5[%c0_24, %c0_25] : memref<8x72xf32, #tpu.memory_space<vmem>>, vector<8x72xf32>
    %cst_26 = arith.constant dense<0.000000e+00> : vector<8x256xf32>
    %54 = tpu.matmul %53, %52, %cst_26 {dimension_numbers = #tpu.dot_dimension_numbers<[1], [0], [0], [1], [0, 0, 1, 1], [], []>} : vector<8x72xf32>, vector<72x256xf32>, vector<8x256xf32> -> vector<8x256xf32>
    %55 = vector.broadcast %0 : vector<1x256xf32> to vector<8x256xf32>
    %56 = arith.mulf %54, %55 : vector<8x256xf32>
    %cst_27 = arith.constant dense<0.000000e+00> : vector<8xf32>
    %57 = vector.multi_reduction <add>, %56, %cst_27 [1] : vector<8x256xf32> to vector<8xf32>
    %58 = vector.shape_cast %57 : vector<8xf32> to vector<8x1xf32>
    %cst_28 = arith.constant 7.812500e-03 : f32
    %59 = vector.broadcast %cst_28 : f32 to vector<8x1xf32>
    %60 = arith.mulf %58, %59 : vector<8x1xf32>
    %61 = arith.mulf %56, %56 : vector<8x256xf32>
    %cst_29 = arith.constant dense<0.000000e+00> : vector<8xf32>
    %62 = vector.multi_reduction <add>, %61, %cst_29 [1] : vector<8x256xf32> to vector<8xf32>
    %63 = vector.shape_cast %62 : vector<8xf32> to vector<8x1xf32>
    %cst_30 = arith.constant 7.812500e-03 : f32
    %64 = vector.broadcast %cst_30 : f32 to vector<8x1xf32>
    %65 = arith.mulf %63, %64 : vector<8x1xf32>
    %66 = arith.mulf %60, %60 : vector<8x1xf32>
    %67 = arith.subf %65, %66 : vector<8x1xf32>
    %cst_31 = arith.constant 0.000000e+00 : f32
    %68 = vector.broadcast %cst_31 : f32 to vector<8x1xf32>
    %69 = arith.maximumf %67, %68 : vector<8x1xf32>
    %c0_32 = arith.constant 0 : index
    %c0_33 = arith.constant 0 : index
    %70 = vector.load %arg6[%c0_32, %c0_33] : memref<8x1xf32, #tpu.memory_space<vmem>>, vector<8x1xf32>
    %cst_34 = arith.constant 9.99999974E-6 : f32
    %71 = vector.broadcast %cst_34 : f32 to vector<8x1xf32>
    %72 = arith.addf %69, %71 : vector<8x1xf32>
    %73 = math.rsqrt %72 : vector<8x1xf32>
    %74 = arith.mulf %70, %73 : vector<8x1xf32>
    %c0_35 = arith.constant 0 : index
    %c0_36 = arith.constant 0 : index
    %75 = vector.load %arg7[%c0_35, %c0_36] : memref<8x1xf32, #tpu.memory_space<vmem>>, vector<8x1xf32>
    %76 = arith.mulf %60, %74 : vector<8x1xf32>
    %77 = arith.subf %75, %76 : vector<8x1xf32>
    %78 = vector.broadcast %74 : vector<8x1xf32> to vector<8x256xf32>
    %79 = arith.mulf %54, %78 : vector<8x256xf32>
    %80 = vector.broadcast %77 : vector<8x1xf32> to vector<8x256xf32>
    %81 = arith.addf %79, %80 : vector<8x256xf32>
    %cst_37 = arith.constant 0.000000e+00 : f32
    %82 = vector.broadcast %cst_37 : f32 to vector<8x256xf32>
    %83 = arith.maximumf %81, %82 : vector<8x256xf32>
    %c0_38 = arith.constant 0 : index
    %c0_39 = arith.constant 0 : index
    %84 = vector.load %arg8[%c0_38, %c0_39] : memref<8x256xf32, #tpu.memory_space<vmem>>, vector<8x256xf32>
    tpu.vector_store %arg8[%c0_38, %c0_39], %83 {strides = array<i32>} : memref<8x256xf32, #tpu.memory_space<vmem>>, vector<8x256xf32>,
    return
  }
}

</mosaic_0001>

<bundles_post_ra>
// kernel: pool_double_conv.1
= control target key start
LH: loop header
LB: loop body
LE: loop exit
PB: predicated region body
PF: predicated region fallthrough
CT: control target
= control target key end

     0   :  { %s504_s9 = smov 9   ;;  %s505_s10 = smov 11   ;;  %v512_v3 = vmov 0.0   ;;  %v36_v4 = vlaneseq  ;;  %vm91_vm8 = vcmask 588800   ;;  %s708_s0 = inlined_call_operand.vmem [shape: f32[8,256], index: 0, kind: input, shape index: {}]   ;;  %s709_s2 = inlined_call_operand.vmem [shape: f32[8,72], index: 2, kind: input, shape index: {}]   ;;  %s710_s1 = inlined_call_operand.vmem [shape: f32[1,256], index: 1, kind: input, shape index: {}]   ;;  %s711_s3 = inlined_call_operand.vmem [shape: f32[8,1], index: 3, kind: input, shape index: {}]   ;;  %s712_s4 = inlined_call_operand.vmem [shape: f32[8,1], index: 4, kind: input, shape index: {}]   ;;  %s713_s5 = inlined_call_operand.vmem [shape: f32[8,72], index: 5, kind: input, shape index: {}]   ;;  %s714_s6 = inlined_call_operand.vmem [shape: f32[8,1], index: 6, kind: input, shape index: {}]   ;;  %s715_s7 = inlined_call_operand.vmem [shape: f32[8,1], index: 7, kind: input, shape index: {}]   ;;  %s716_s8 = inlined_call_operand.vmem [shape: f32[8,256], index: 8, kind: output, shape index: {}]  }
   0x1   :  { %v562_v0 = vld [vmem:[%s708_s0] sm:$0xff]  ;;  %v567_v1 = vld [vmem:[%s708_s0 + $0x8] sm:$0xff]  ;;  %s506_s11 = smov 1   ;;  %s507_s12 = smov 10   ;;  %159 = vmatprep.mubr.f32.mxu0 %v512_v3  ;;  %333 = vmatprep.mubr.f32.mxu1 %v512_v3 }
   0x2   :  { %v438_v2 = vpack.i.bf16 %v567_v1, %v562_v0  ;;  %s508_s13 = smov 127   ;;  %s509_s0 = smov 119   ;;  %v583_v5 = vand.u32 127, %v36_v4  ;;  %v90_v53 = vld [vmem:[%s709_s2] sm:$0xff]  ;;  %v168_v54 = vshrl.u32 %v36_v4, 7  ;;  %v513_v4 = vmov 0  }
   0x3   :  { %s510_s14 = smov 118   ;;  %s511_s15 = smov 117   ;;  %v29_v56 = vld [vmem:[%s710_s1] sm:$0x3]  ;;  %463 = vset.pattern.permute.xlu0 %v513_v4  ;;  %464 = vset.pattern.permute.xlu1 %v513_v4 }
   0x4   :  { %439 = vrot.lane.b32.xlu1 %v438_v2, %s504_s9  ;;  %429 = vrot.lane.b32.xlu0 %v438_v2, %s505_s10  ;;  %vm38_vm0 = vcmp.lt.s32.totalorder %v583_v5, 11  ;;  %vm45_vm1 = vcmp.lt.s32.totalorder %v583_v5, 10  ;;  %vm52_vm2 = vcmp.lt.s32.totalorder %v583_v5, 9  ;;  %vm59_vm3 = vcmp.lt.s32.totalorder %v583_v5, 1 }
   0x5   :  { %vm66_vm4 = vcmp.lt.s32.totalorder %v583_v5, 127  ;;  %vm73_vm5 = vcmp.lt.s32.totalorder %v583_v5, 119  ;;  %vm80_vm6 = vcmp.lt.s32.totalorder %v583_v5, 118  ;;  %vm87_vm7 = vcmp.lt.s32.totalorder %v583_v5, 117 }
   0x6   :  { %v169_v55 = vsub.s32 0, %v168_v54  ;;  %v173_v57 = vsub.s32 1, %v168_v54 }
   0x8   :  { %444 = vrot.lane.b32.xlu1 %v438_v2, %s506_s11  ;;  %434 = vrot.lane.b32.xlu0 %v438_v2, %s507_s12  ;;  %v635_v58 = vrot.slane %v29_v56, %v169_v55  ;;  %v637_v59 = vrot.slane %v29_v56, %v173_v57 }
   0xc   :  { %449 = vrot.lane.b32.xlu0 %v438_v2, %s508_s13  ;;  %454 = vrot.lane.b32.xlu1 %v438_v2, %s509_s0 }
  0x10   :  { %459 = vrot.lane.b32.xlu0 %v438_v2, %s510_s14  ;;  %83 = vrot.lane.b32.xlu1 %v562_v0, %s511_s15 }
  0x14   :  { %85 = vrot.lane.b32.xlu0 %v567_v1, %s511_s15 }
  0x76   :  { %v440_v6 = vpop.permute.xlu1 %439  ;;  %v430_v7 = vpop.permute.xlu0 %429 }
  0x77   :  { %v432_v8 = vunpack.i.h.bf16 %v430_v7  ;;  %v431_v9 = vunpack.i.l.bf16 %v430_v7  ;;  %v442_v10 = vunpack.i.h.bf16 %v440_v6  ;;  %v441_v11 = vunpack.i.l.bf16 %v440_v6 }
  0x79   :  { %v39_v18 = vsel %vm38_vm0, %v431_v9, %v432_v8  ;;  %v40_v19 = vsel %vm38_vm0, %v432_v8, %v431_v9  ;;  %v53_v22 = vsel %vm52_vm2, %v441_v11, %v442_v10  ;;  %v54_v33 = vsel %vm52_vm2, %v442_v10, %v441_v11 }
  0x7a   :  { %v445_v12 = vpop.permute.xlu1 %444  ;;  %v435_v13 = vpop.permute.xlu0 %434 }
  0x7b   :  { %v447_v14 = vunpack.i.h.bf16 %v445_v12  ;;  %v446_v15 = vunpack.i.l.bf16 %v445_v12  ;;  %v437_v16 = vunpack.i.h.bf16 %v435_v13  ;;  %v436_v17 = vunpack.i.l.bf16 %v435_v13 }
  0x7d   :  { %v46_v20 = vsel %vm45_vm1, %v436_v17, %v437_v16  ;;  %v47_v21 = vsel %vm45_vm1, %v437_v16, %v436_v17  ;;  %v60_v23 = vsel %vm59_vm3, %v446_v15, %v447_v14  ;;  %v61_v34 = vsel %vm59_vm3, %v447_v14, %v446_v15  ;;  %v192_v14 = vld [vmem:[%s711_s3] sm:$0xff] }
  0x7e   :  { %v386_v24 = vpack.c.bf16 %v46_v20, %v39_v18  ;;  %v388_v25 = vpack.c.bf16 %v47_v21, %v40_v19  ;;  %v450_v26 = vpop.permute.xlu0 %449  ;;  %v455_v27 = vpop.permute.xlu1 %454  ;;  %v390_v32 = vpack.c.bf16 %v60_v23, %v53_v22  ;;  %v392_v39 = vpack.c.bf16 %v61_v34, %v54_v33  ;;  %v196_v17 = vld [vmem:[%s712_s4] sm:$0xff] }
  0x7f   :  { %v452_v28 = vunpack.i.h.bf16 %v450_v26  ;;  %v451_v29 = vunpack.i.l.bf16 %v450_v26  ;;  %v457_v30 = vunpack.i.h.bf16 %v455_v27  ;;  %v456_v31 = vunpack.i.l.bf16 %v455_v27 }
  0x80   :  { %387 = vmatprep.subr.bf16.mxu0 %v386_v24 }
  0x81   :  { %389 = vmatpush1.bf16.msra.mxu0 %v388_v25  ;;  %v68_v35 = vsel %vm66_vm4, %v452_v28, %v451_v29  ;;  %v67_v38 = vsel %vm66_vm4, %v451_v29, %v452_v28  ;;  %v75_v42 = vsel %vm73_vm5, %v457_v30, %v456_v31  ;;  %v74_v46 = vsel %vm73_vm5, %v456_v31, %v457_v30 }
  0x82   :  { %391 = vmatprep.subr.bf16.mxu0 %v390_v32  ;;  %v460_v36 = vpop.permute.xlu0 %459  ;;  %v394_v37 = vpack.c.bf16 %v68_v35, %v567_v1  ;;  %v396_v43 = vpack.c.bf16 %v67_v38, %v562_v0  ;;  %v84_v48 = vpop.permute.xlu1 %83 }
  0x83   :  { %v462_v40 = vunpack.i.h.bf16 %v460_v36  ;;  %v461_v41 = vunpack.i.l.bf16 %v460_v36 }
  0x85   :  { %393 = vmatpush1.bf16.msra.mxu0 %v392_v39  ;;  %v82_v44 = vsel %vm80_vm6, %v462_v40, %v461_v41  ;;  %v81_v47 = vsel %vm80_vm6, %v461_v41, %v462_v40 }
  0x86   :  { %395 = vmatprep.subr.bf16.mxu0 %v394_v37  ;;  %v398_v45 = vpack.c.bf16 %v82_v44, %v75_v42  ;;  %v86_v49 = vpop.permute.xlu0 %85  ;;  %v400_v50 = vpack.c.bf16 %v81_v47, %v74_v46 }
  0x87   :  { %v89_v51 = vsel %vm87_vm7, %v86_v49, %v84_v48  ;;  %v88_v52 = vsel %vm87_vm7, %v84_v48, %v86_v49 }
  0x89   :  { %397 = vmatpush1.bf16.msra.mxu0 %v396_v43 }
  0x8a   :  { %399 = vmatprep.subr.bf16.mxu0 %v398_v45 }
  0x8d   :  { %401 = vmatpush1.bf16.msra.mxu0 %v400_v50 }
  0x8e   :  { %111 = vmatprep.subr.mxu0 %v89_v51 }
  0x91   :  { %112 = vmatpush1.msra.mxu0 %v88_v52 }
  0x92   :  { %384 = vmatmul.mubr.msk.f32.vlgmr.msra.gmra.mrb[0].mxu0 %vm91_vm8, %v90_v53 }
 0x165   :  { %v161_v60 = vpop.f32.mrb[0].mxu0 }
 0x166   :  { %v177_v61 = vmul.f32 %v635_v58, %v161_v60  ;;  %v163_v62 = vpop.f32.mrb[1].mxu0 }
 0x167   :  { %v178_v63 = vmul.f32 %v637_v59, %v163_v62 }
 0x168   :  { %v183_v0 = vmul.f32 %v177_v61, %v177_v61 }
 0x169   :  { %v184_v1 = vmul.f32 %v178_v63, %v178_v63  ;;  %v179_v2 = vadd.f32 %v178_v63, %v177_v61 }
 0x16b   :  { %180 = vadd.xlane.f32.xlu1 %v179_v2  ;;  %v185_v3 = vadd.f32 %v184_v1, %v183_v0 }
 0x16d   :  { %186 = vadd.xlane.f32.xlu0 %v185_v3 }
 0x1f8   :  { %v181_v6 = vpop.xlane.xlu1 %180 }
 0x1f9   :  { %v182_v7 = vmul.f32 0.0078125, %v181_v6 }
 0x1fa   :  { %v187_v8 = vpop.xlane.xlu0 %186 }
 0x1fb   :  { %v189_v9 = vmul.f32 %v182_v7, %v182_v7  ;;  %v188_v10 = vmul.f32 0.0078125, %v187_v8 }
 0x1fd   :  { %v190_v11 = vsub.f32 %v188_v10, %v189_v9 }
 0x1ff   :  { %v191_v12 = vmax.f32 %v190_v11, 0.0 }
 0x201   :  { %v193_v13 = vadd.f32 1e-05, %v191_v12 }
 0x203   :  { %500 = vrsqrt.f32 %v193_v13 }
 0x20d   :  { %v501_v15 = vpop.eup %500 }
 0x20e   :  { %v195_v16 = vmul.f32 %v501_v15, %v192_v14 }
 0x210   :  { %201 = vperm.xlu0 %463, %v195_v16   ;;  %v197_v18 = vmul.f32 %v195_v16, %v182_v7  ;;  %v265_v16 = vld [vmem:[%s713_s5] sm:$0xff] }
 0x212   :  { %v198_v19 = vsub.f32 %v196_v17, %v197_v18 }
 0x214   :  { %208 = vperm.xlu1 %464, %v198_v19  }
 0x28f   :  { %v202_v20 = vpop.permute.xlu0 %201 }
 0x290   :  { %v204_v21 = vmul.f32 %v202_v20, %v161_v60  ;;  %v205_v22 = vmul.f32 %v202_v20, %v163_v62 }
 0x293   :  { %v209_v23 = vpop.permute.xlu1 %208 }
 0x294   :  { %v211_v24 = vadd.f32 %v209_v23, %v204_v21  ;;  %v212_v25 = vadd.f32 %v209_v23, %v205_v22 }
 0x296   :  { %v213_v26 = vmax.f32 %v211_v24, 0.0  ;;  %v214_v27 = vmax.f32 %v212_v25, 0.0 }
 0x298   :  { %v215_v28 = vmul.f32 %v213_v26, %v635_v58  ;;  %v216_v29 = vmul.f32 %v214_v27, %v637_v59 }
 0x29a   :  { %259 = vrot.lane.b32.xlu0 %v215_v28, %s511_s15  ;;  %v465_v30 = vpack.i.bf16 %v216_v29, %v215_v28 }
 0x29c   :  { %466 = vrot.lane.b32.xlu1 %v465_v30, %s505_s10 }
 0x2a0   :  { %471 = vrot.lane.b32.xlu1 %v465_v30, %s507_s12 }
 0x2a4   :  { %476 = vrot.lane.b32.xlu1 %v465_v30, %s504_s9 }
 0x2a8   :  { %481 = vrot.lane.b32.xlu1 %v465_v30, %s506_s11 }
 0x2ac   :  { %486 = vrot.lane.b32.xlu1 %v465_v30, %s508_s13 }
 0x2b0   :  { %491 = vrot.lane.b32.xlu1 %v465_v30, %s509_s0 }
 0x2b4   :  { %496 = vrot.lane.b32.xlu1 %v465_v30, %s510_s14 }
 0x2b8   :  { %261 = vrot.lane.b32.xlu1 %v216_v29, %s511_s15 }
 0x30c   :  { %v260_v14 = vpop.permute.xlu0 %259 }
 0x30e   :  { %v467_v31 = vpop.permute.xlu1 %466 }
 0x30f   :  { %v469_v32 = vunpack.i.h.bf16 %v467_v31  ;;  %v468_v33 = vunpack.i.l.bf16 %v467_v31 }
 0x311   :  { %v221_v37 = vsel %vm38_vm0, %v468_v33, %v469_v32  ;;  %v222_v39 = vsel %vm38_vm0, %v469_v32, %v468_v33 }
 0x312   :  { %v472_v34 = vpop.permute.xlu1 %471 }
 0x313   :  { %v474_v35 = vunpack.i.h.bf16 %v472_v34  ;;  %v473_v36 = vunpack.i.l.bf16 %v472_v34  ;;  %v359_v34 = vld [vmem:[%s715_s7] sm:$0xff] }
 0x315   :  { %v227_v38 = vsel %vm45_vm1, %v473_v36, %v474_v35  ;;  %v228_v40 = vsel %vm45_vm1, %v474_v35, %v473_v36 }
 0x316   :  { %v477_v41 = vpop.permute.xlu1 %476  ;;  %v402_v42 = vpack.c.bf16 %v227_v38, %v221_v37  ;;  %v404_v43 = vpack.c.bf16 %v228_v40, %v222_v39 }
 0x317   :  { %v479_v44 = vunpack.i.h.bf16 %v477_v41  ;;  %v478_v45 = vunpack.i.l.bf16 %v477_v41 }
 0x318   :  { %403 = vmatprep.subr.bf16.mxu1 %v402_v42 }
 0x319   :  { %405 = vmatpush1.bf16.msra.mxu1 %v404_v43  ;;  %v233_v49 = vsel %vm52_vm2, %v478_v45, %v479_v44  ;;  %v234_v51 = vsel %vm52_vm2, %v479_v44, %v478_v45 }
 0x31a   :  { %v482_v46 = vpop.permute.xlu1 %481 }
 0x31b   :  { %v484_v47 = vunpack.i.h.bf16 %v482_v46  ;;  %v483_v48 = vunpack.i.l.bf16 %v482_v46 }
 0x31d   :  { %v239_v50 = vsel %vm59_vm3, %v483_v48, %v484_v47  ;;  %v240_v52 = vsel %vm59_vm3, %v484_v47, %v483_v48 }
 0x31e   :  { %v487_v53 = vpop.permute.xlu1 %486  ;;  %v406_v54 = vpack.c.bf16 %v239_v50, %v233_v49  ;;  %v408_v55 = vpack.c.bf16 %v240_v52, %v234_v51 }
 0x31f   :  { %v489_v56 = vunpack.i.h.bf16 %v487_v53  ;;  %v488_v57 = vunpack.i.l.bf16 %v487_v53 }
 0x320   :  { %407 = vmatprep.subr.bf16.mxu1 %v406_v54 }
 0x321   :  { %409 = vmatpush1.bf16.msra.mxu1 %v408_v55  ;;  %v246_v60 = vsel %vm66_vm4, %v489_v56, %v488_v57  ;;  %v245_v61 = vsel %vm66_vm4, %v488_v57, %v489_v56 }
 0x322   :  { %v492_v62 = vpop.permute.xlu1 %491  ;;  %v410_v63 = vpack.c.bf16 %v246_v60, %v216_v29  ;;  %v412_v0 = vpack.c.bf16 %v245_v61, %v215_v28 }
 0x323   :  { %v494_v1 = vunpack.i.h.bf16 %v492_v62  ;;  %v493_v2 = vunpack.i.l.bf16 %v492_v62 }
 0x324   :  { %411 = vmatprep.subr.bf16.mxu1 %v410_v63 }
 0x325   :  { %413 = vmatpush1.bf16.msra.mxu1 %v412_v0  ;;  %v252_v7 = vsel %vm73_vm5, %v494_v1, %v493_v2  ;;  %v251_v9 = vsel %vm73_vm5, %v493_v2, %v494_v1 }
 0x326   :  { %v497_v3 = vpop.permute.xlu1 %496 }
 0x327   :  { %v499_v4 = vunpack.i.h.bf16 %v497_v3  ;;  %v498_v6 = vunpack.i.l.bf16 %v497_v3 }
 0x329   :  { %v258_v8 = vsel %vm80_vm6, %v499_v4, %v498_v6  ;;  %v257_v10 = vsel %vm80_vm6, %v498_v6, %v499_v4 }
 0x32a   :  { %v262_v11 = vpop.permute.xlu1 %261  ;;  %v414_v12 = vpack.c.bf16 %v258_v8, %v252_v7  ;;  %v416_v13 = vpack.c.bf16 %v257_v10, %v251_v9 }
 0x32b   :  { %v264_v15 = vsel %vm87_vm7, %v262_v11, %v260_v14  ;;  %v263_v17 = vsel %vm87_vm7, %v260_v14, %v262_v11 }
 0x32c   :  { %415 = vmatprep.subr.bf16.mxu1 %v414_v12 }
 0x32d   :  { %417 = vmatpush1.bf16.msra.mxu1 %v416_v13 }
 0x32e   :  { %285 = vmatprep.subr.mxu1 %v264_v15 }
 0x331   :  { %286 = vmatpush1.msra.mxu1 %v263_v17 }
 0x332   :  { %385 = vmatmul.mubr.msk.f32.vlgmr.msra.gmra.mrb[0].mxu1 %vm91_vm8, %v265_v16 }
 0x405   :  { %v335_v18 = vpop.f32.mrb[0].mxu1 }
 0x406   :  { %v340_v19 = vmul.f32 %v335_v18, %v635_v58  ;;  %v337_v20 = vpop.f32.mrb[1].mxu1  ;;  %v355_v58 = vld [vmem:[%s714_s6] sm:$0xff] }
 0x407   :  { %v341_v21 = vmul.f32 %v337_v20, %v637_v59 }
 0x408   :  { %v346_v22 = vmul.f32 %v340_v19, %v340_v19 }
 0x409   :  { %v347_v23 = vmul.f32 %v341_v21, %v341_v21  ;;  %v342_v24 = vadd.f32 %v341_v21, %v340_v19 }
 0x40b   :  { %343 = vadd.xlane.f32.xlu0 %v342_v24  ;;  %v348_v25 = vadd.f32 %v347_v23, %v346_v22 }
 0x40d   :  { %349 = vadd.xlane.f32.xlu1 %v348_v25 }
 0x498   :  { %v344_v26 = vpop.xlane.xlu0 %343 }
 0x499   :  { %v345_v27 = vmul.f32 0.0078125, %v344_v26 }
 0x49a   :  { %v350_v28 = vpop.xlane.xlu1 %349 }
 0x49b   :  { %v352_v5 = vmul.f32 %v345_v27, %v345_v27  ;;  %v351_v29 = vmul.f32 0.0078125, %v350_v28 }
 0x49d   :  { %v353_v30 = vsub.f32 %v351_v29, %v352_v5 }
 0x49f   :  { %v354_v31 = vmax.f32 %v353_v30, 0.0 }
 0x4a1   :  { %v356_v32 = vadd.f32 1e-05, %v354_v31 }
 0x4a3   :  { %502 = vrsqrt.f32 %v356_v32 }
 0x4ad   :  { %v503_v59 = vpop.eup %502 }
 0x4ae   :  { %v358_v33 = vmul.f32 %v503_v59, %v355_v58 }
 0x4b0   :  { %364 = vperm.xlu0 %463, %v358_v33   ;;  %v360_v35 = vmul.f32 %v358_v33, %v345_v27 }
 0x4b2   :  { %v361_v36 = vsub.f32 %v359_v34, %v360_v35 }
 0x4b4   :  { %371 = vperm.xlu1 %464, %v361_v36  }
 0x52f   :  { %v365_v37 = vpop.permute.xlu0 %364 }
 0x530   :  { %v367_v38 = vmul.f32 %v365_v37, %v335_v18  ;;  %v368_v39 = vmul.f32 %v365_v37, %v337_v20 }
 0x533   :  { %v372_v40 = vpop.permute.xlu1 %371 }
 0x534   :  { %v374_v41 = vadd.f32 %v372_v40, %v367_v38  ;;  %v375_v42 = vadd.f32 %v372_v40, %v368_v39 }
 0x536   :  { %v376_v43 = vmax.f32 %v374_v41, 0.0  ;;  %v377_v44 = vmax.f32 %v375_v42, 0.0 }
 0x538   :  { %378 = vst [vmem:[%s716_s8] sm:$0xff] %v376_v43  ;;  %379 = vst [vmem:[%s716_s8 + $0x8] sm:$0xff] %v377_v44 }

</bundles_post_ra>
